<compile_context>
chip_gen: v7x
topology: tpu7x:2x2x1
jax: 0.10.0
libtpu: 0.0.40
codegen_flags: <defaults>
</compile_context>

<pallas_src>
import jax
import jax.numpy as jnp
from jax.experimental import pallas as pl
from jax.experimental.pallas import tpu as pltpu


def _ifnode5_kernel(w_ref, b_ref, x_ref, o_ref):
    # h = W @ X_tile + b   (MXU matmul, full f32), then heaviside (h >= 0).
    h = jnp.dot(
        w_ref[...],
        x_ref[...],
        preferred_element_type=jnp.float32,
        precision=jax.lax.Precision.HIGHEST,
    )
    h = h + b_ref[...]                      # (T, 1) broadcasts over lanes
    o_ref[...] = (h >= 0.0).astype(o_ref.dtype)


def _choose_block_n(n, block_n_max):
    """Lane-dense tile width: multiple of 128, <= block_n_max, and at least
    two grid steps for inputs wider than one vreg row (v7x dual-TC)."""
    n128 = ((n + 127) // 128) * 128
    bn = min(block_n_max, n128)
    if (n128 + bn - 1) // bn < 2 and n128 > 128:
        bn = max(128, (n128 // 2 // 128) * 128)
    return bn


def ifnode5_forward(x_seq, weight, bias, *, block_n=4096):
    """x_seq: [T, B, C, H, W]; weight: [T, T]; bias: [T]."""
    T = x_seq.shape[0]
    orig_shape = x_seq.shape
    x_flat = x_seq.reshape(T, -1)           # [T, N]
    N = x_flat.shape[1]

    bn = _choose_block_n(N, block_n)
    num_tiles = pl.cdiv(N, bn)
    n_pad = num_tiles * bn
    if n_pad != N:
        # Pad to a multiple of the tile width (zeros; padded lanes are sliced
        # off below, so their spike values are irrelevant).
        x_flat = jnp.pad(x_flat, ((0, 0), (0, n_pad - N)))

    b2d = bias.reshape(T, 1)

    out_flat = pl.pallas_call(
        _ifnode5_kernel,
        out_shape=jax.ShapeDtypeStruct((T, n_pad), x_seq.dtype),
        grid_spec=pltpu.PrefetchScalarGridSpec(
            num_scalar_prefetch=0,
            grid=(num_tiles,),
            in_specs=[
                pl.BlockSpec((T, T), lambda j: (0, 0)),     # weight (resident)
                pl.BlockSpec((T, 1), lambda j: (0, 0)),     # bias (resident)
                pl.BlockSpec((T, bn), lambda j: (0, j)),    # x tile along N
            ],
            out_specs=pl.BlockSpec((T, bn), lambda j: (0, j)),
        ),
        compiler_params=pltpu.CompilerParams(
            dimension_semantics=("parallel",)),
    )(weight, b2d, x_flat)

    if n_pad != N:
        out_flat = out_flat[:, :N]
    return out_flat.reshape(orig_shape)


def _reference(x_seq, weight, bias):
    x_flat = x_seq.reshape(x_seq.shape[0], -1)
    h = jnp.matmul(weight, x_flat,
                   precision=jax.lax.Precision.HIGHEST) + bias[:, None]
    return (h >= 0.0).astype(x_seq.dtype).reshape(x_seq.shape)


if __name__ == "__main__":
    key = jax.random.PRNGKey(0)
    T = 8

    # Deterministic parameter init (Linear(T, T)-shaped); bias = -1 per module.
    kx1, kx2, kw = jax.random.split(key, 3)
    bound = 1.0 / (T ** 0.5)
    weight = jax.random.uniform(kw, (T, T), dtype=jnp.float32,
                                minval=-bound, maxval=bound)
    bias = jnp.full((T,), -1.0, dtype=jnp.float32)

    # Case 1: small shape, N = B*C*H*W = 128 (single lane-dense tile).
    x1 = jax.random.normal(kx1, (T, 2, 4, 4, 4), dtype=jnp.float32)
    out1 = ifnode5_forward(x1, weight, bias)
    jax.block_until_ready(out1)
    assert out1.shape == x1.shape
    assert jnp.array_equal(out1, _reference(x1, weight, bias)), "mismatch (case 1)"

    # Case 2: N = 600 (not a multiple of 128) -> exercises padding + multi-tile grid.
    x2 = jax.random.normal(kx2, (T, 2, 3, 10, 10), dtype=jnp.float32)
    out2 = ifnode5_forward(x2, weight, bias)
    jax.block_until_ready(out2)
    assert out2.shape == x2.shape
    assert jnp.array_equal(out2, _reference(x2, weight, bias)), "mismatch (case 2)"

    print("KERNEL_OK")
</pallas_src>

<mosaic_0001>
module attributes {stable_mosaic.version = 11 : i64} {
  func.func @_ifnode5_kernel(%arg0: i32, %arg1: memref<8x8xf32, #tpu.memory_space<vmem>>, %arg2: memref<8x1xf32, #tpu.memory_space<vmem>>, %arg3: memref<8x128xf32, #tpu.memory_space<vmem>>, %arg4: memref<8x128xf32, #tpu.memory_space<vmem>>) attributes {dimension_semantics = [#tpu.dimension_semantics<parallel>], iteration_bounds = array<i64: 1>, scalar_prefetch = 0 : i64, scratch_operands = 0 : i64, tpu.core_type = #tpu.core_type<tc>, window_params = [{pipeline_mode = #tpu.pipeline_mode<synchronous>, transform_indices = @transform_0, window_bounds = array<i64: 8, 8>}, {pipeline_mode = #tpu.pipeline_mode<synchronous>, transform_indices = @transform_1, window_bounds = array<i64: 8, 1>}, {transform_indices = @transform_2, window_bounds = array<i64: 8, 128>}, {transform_indices = @transform_3, window_bounds = array<i64: 8, 128>}]} {
    %c0 = arith.constant 0 : index
    %c0_0 = arith.constant 0 : index
    %0 = vector.load %arg1[%c0, %c0_0] : memref<8x8xf32, #tpu.memory_space<vmem>>, vector<8x8xf32>
    %c0_1 = arith.constant 0 : index
    %c0_2 = arith.constant 0 : index
    %1 = vector.load %arg3[%c0_1, %c0_2] : memref<8x128xf32, #tpu.memory_space<vmem>>, vector<8x128xf32>
    %cst = arith.constant dense<0.000000e+00> : vector<8x128xf32>
    %2 = tpu.matmul %0, %1, %cst {dimension_numbers = #tpu.dot_dimension_numbers<[1], [0], [0], [1], [0, 0, 1, 1], [], []>, precision = #tpu.contract_precision<fp32>} : vector<8x8xf32>, vector<8x128xf32>, vector<8x128xf32> -> vector<8x128xf32>
    %c0_3 = arith.constant 0 : index
    %c0_4 = arith.constant 0 : index
    %3 = vector.load %arg2[%c0_3, %c0_4] : memref<8x1xf32, #tpu.memory_space<vmem>>, vector<8x1xf32>
    %4 = vector.broadcast %3 : vector<8x1xf32> to vector<8x128xf32>
    %5 = arith.addf %2, %4 : vector<8x128xf32>
    %cst_5 = arith.constant 0.000000e+00 : f32
    %6 = vector.broadcast %cst_5 : f32 to vector<8x128xf32>
    %7 = arith.cmpf oge, %5, %6 : vector<8x128xf32>
    %8 = arith.extui %7 : vector<8x128xi1> to vector<8x128xi32>
    %9 = arith.sitofp %8 : vector<8x128xi32> to vector<8x128xf32>
    %c0_6 = arith.constant 0 : index
    %c0_7 = arith.constant 0 : index
    %10 = vector.load %arg4[%c0_6, %c0_7] : memref<8x128xf32, #tpu.memory_space<vmem>>, vector<8x128xf32>
    tpu.vector_store %arg4[%c0_6, %c0_7], %9 {strides = array<i32>} : memref<8x128xf32, #tpu.memory_space<vmem>>, vector<8x128xf32>,
    return
  }
  func.func @transform_0(%arg0: i32) -> (i32, i32) {
    %c0_i32 = arith.constant 0 : i32
    %c0_i32_0 = arith.constant 0 : i32
    %c0_i32_1 = arith.constant 0 : i32
    return %c0_i32, %c0_i32_0 : i32, i32
  }
  func.func @transform_1(%arg0: i32) -> (i32, i32) {
    %c0_i32 = arith.constant 0 : i32
    %c0_i32_0 = arith.constant 0 : i32
    %c0_i32_1 = arith.constant 0 : i32
    return %c0_i32, %c0_i32_0 : i32, i32
  }
  func.func @transform_2(%arg0: i32) -> (i32, i32) {
    %c0_i32 = arith.constant 0 : i32
    %c0_i32_0 = arith.constant 0 : i32
    return %c0_i32, %arg0 : i32, i32
  }
  func.func @transform_3(%arg0: i32) -> (i32, i32) {
    %c0_i32 = arith.constant 0 : i32
    %c0_i32_0 = arith.constant 0 : i32
    return %c0_i32, %arg0 : i32, i32
  }
}

</mosaic_0001>

<bundles_post_ra>
// kernel: tpu_custom_call.1
= control target key start
LH: loop header
LB: loop body
LE: loop exit
PB: predicated region body
PF: predicated region fallthrough
CT: control target
= control target key end

     0   :  { %vm23_vm0 = vcmask 64512   ;;  %v573_v2 = vmov 0.0   ;;  %vm574_vm1 = vmmov 0   ;;  %s624_s0 = inlined_call_operand.vmem [shape: f32[8,8], index: 0, kind: input, shape index: {}]   ;;  %s625_s1 = inlined_call_operand.vmem [shape: f32[8,1], index: 1, kind: input, shape index: {}]   ;;  %s626_s2 = inlined_call_operand.vmem [shape: f32[8,128], index: 2, kind: input, shape index: {}]   ;;  %s627_s3 = inlined_call_operand.hbm [shape: f32[8,128], index: 3, kind: output, shape index: {}]  }
   0x1   :  { %v16_v0 = vld [vmem:[%s626_s2] sm:$0xff]  ;;  %519 = vmatprep.subr.mxu0 %v573_v2  ;;  %521 = vmatprep.mubr.msk.f32.mxu0 %vm574_vm1, %v573_v2 }
   0x2   :  { %v15_v1 = vld [vmem:[%s624_s0] sm:$0xff]  ;;  %v28_v3 = vand.u32 4294901760, %v16_v0 }
   0x3   :  { %v25_v4 = vsel %vm23_vm0, %v15_v1, 0 }
   0x4   :  { %8 = vsyncpa [#allocation3], 0  ;;  %v93_v5 = vand.u32 4294901760, %v25_v4  ;;  %504 = vmatprep.subr.mxu1 %v573_v2  ;;  %506 = vmatprep.mubr.msk.f32.mxu1 %vm574_vm1, %v573_v2  ;;  %v105_v6 = vsub.f32 %v16_v0, %v28_v3  ;;  %v17_v7 = vld [vmem:[%s625_s1] sm:$0xff]  ;;  %v575_v10 = vmov 0   ;;  %s576_s0 = smov [#allocation2]  }
   0x5   :  { %520 = vmatpush3.msra.mxu0 %v28_v3  ;;  %505 = vmatpush3.msra.mxu1 %v28_v3  ;;  %s483_s1 = sshll.u32 %s576_s0, 4  ;;  %s484_s1 = int_to_ptr.vmem [resolvable:$true] %s483_s1 }
   0x6   :  { %v94_v8 = vsub.f32 %v25_v4, %v93_v5  ;;  %509 = vmatprep.subr.mxu1 %v573_v2  ;;  %524 = vmatprep.subr.mxu0 %v573_v2  ;;  %v106_v9 = vand.u32 4294901760, %v105_v6  ;;  %s549_s17 = scalar_lea.vmem %s484_s1, 128  ;;  %p554_p1 = scmp.lt.s32.totalorder %s484_s1, %s484_s1 }
   0x7   :  { %548 = vset.pattern.permute.xlu0 %v575_v10  ;;  %p550_p0 = scmp.ne.s32.totalorder %s484_s1, %s549_s17  ;;  %p555_p2 = scmp.lt.s32.totalorder %s549_s17, %s549_s17 }
   0x8   :  { %v95_v11 = vand.u32 4294901760, %v94_v8  ;;  %20 = vperm.xlu0 %548, %v17_v7   ;;  %v107_v12 = vsub.f32 %v105_v6, %v106_v9 }
   0x9   :  { %p556_p3 = por %p555_p2, %p554_p1 }
   0xa   :  { %522 = vmatmul.mubr.f32.vlgmr.msra.gmra.mrb[0].mxu0 %v95_v11  ;;  %v96_v13 = vsub.f32 %v94_v8, %v95_v11  ;;  %v108_v14 = vand.u32 4294901760, %v107_v12 }
   0xb   :  { %525 = vmatpush3.msra.mxu0 %v106_v9  ;;  %526 = vmatprep.mubr.msk.f32.mxu0 %vm574_vm1, %v573_v2  ;;  %p557_p4 = pnand %p556_p3, %p550_p0 }
   0xc   :  { %v97_v15 = vand.u32 4294901760, %v96_v13  ;;  %529 = vmatprep.subr.mxu0 %v573_v2 }
   0xe   :  { %507 = vmatmul.mubr.f32.vlgmr.msra.gmra.mrb[0].mxu1 %v97_v15 }
   0xf   :  { %510 = vmatpush3.msra.mxu1 %v108_v14  ;;  %511 = vmatprep.mubr.msk.f32.mxu1 %vm574_vm1, %v573_v2 }
  0x10   :  { %514 = vmatprep.subr.mxu1 %v573_v2 }
  0x12   :  { %527 = vmatmul.mubr.f32.vlgmr.msra.gmra.mrb[0].mxu0 %v93_v5 }
  0x13   :  { %530 = vmatpush3.msra.mxu0 %v28_v3  ;;  %531 = vmatprep.mubr.msk.f32.mxu0 %vm574_vm1, %v573_v2 }
  0x16   :  { %512 = vmatmul.mubr.f32.vlgmr.msra.gmra.mrb[0].mxu1 %v93_v5 }
  0x17   :  { %515 = vmatpush3.msra.mxu1 %v105_v6  ;;  %516 = vmatprep.mubr.msk.f32.mxu1 %vm574_vm1, %v573_v2 }
  0x1a   :  { %532 = vmatmul.mubr.f32.vlgmr.msra.gmra.mrb[0].mxu0 %v93_v5 }
  0x1e   :  { %517 = vmatmul.mubr.f32.vlgmr.msra.gmra.mrb[0].mxu1 %v94_v8 }
  0x87   :  { %v21_v18 = vpop.permute.xlu0 %20 }
  0xed   :  { %v469_v16 = vpop.f32.mrb[0].mxu0 }
  0xee   :  { %v533_v17 = vpop.f32.mrb[1].mxu0 }
  0xf1   :  { %v249_v19 = vpop.f32.mrb[0].mxu1 }
  0xf2   :  { %v534_v20 = vadd.f32 %v249_v19, %v21_v18  ;;  %v518_v21 = vpop.f32.mrb[1].mxu1 }
  0xf4   :  { %v535_v22 = vadd.f32 %v534_v20, %v469_v16 }
  0xf6   :  { %vm473_vm2 = vcmp.ge.f32.partialorder %v535_v22, 0.0 }
  0xf7   :  { %v491_v23 = vsel %vm473_vm2, 1.0, %v573_v2 }
  0xf8   :  { %476 = vst [vmem:[#allocation2] sm:$0xff] %v491_v23 }
  0xf9   :  { %560 = shalt.err (!%p557_p4)
}
  0xfa   :  { %s561_s20 = scalar_lea.hbm %s627_s3, 128 }
  0xfb   :  { %p562_p5 = scmp.ne.s32.totalorder %s627_s3, %s561_s20  ;;  %p565_p6 = scmp.lt.u32.totalorder %s561_s20, %s627_s3 }
  0xfd   :  { %p567_p7 = pnand %p565_p6, %p562_p5 }
  0xff   :  { %570 = shalt.err (!%p567_p7)
}
 0x100   :  { %486 = dma.vmem_to_hbm [thread:$0]  %s484_s1, 128, %s627_s3, [#allocation3]  }
 0x101   :  { %571 = dma.done.wait [#allocation3], 128  }
 0x102   :  { %572 = vsyncadd [#allocation3], 4294967168 }
 0x103   :  { %490 = vsyncpa [#allocation3], 1 }

</bundles_post_ra>
